<compile_context>
chip_gen: v7x
topology: tpu7x:2x2x1
jax: 0.10.0
libtpu: 0.0.40
codegen_flags: <defaults>
</compile_context>

<pallas_src>
import jax
import jax.numpy as jnp
from jax import lax
from jax.experimental import pallas as pl
from jax.experimental import pallas as pl  # noqa: F811 (kept single alias)
from jax.experimental.pallas import tpu as pltpu  # noqa: F401 (TPU backend)


# ----------------------------------------------------------------------------
# Kernel 1: fused bidirectional LSTM layer recurrence (one layer).
#
#   gf_ref, gb_ref : (T, B, 4H)  precomputed x @ W_ih^T + b for fwd / bwd
#   whhT_*_ref     : (H, 4H)     pre-transposed recurrent weights
#   out_f/out_b    : (T, B, H)   per-direction hidden states (bwd written back
#                                at its original time index, PyTorch bidir)
#
# grid=(): everything is resident in VMEM; time is iterated with
# lax.fori_loop carrying (h_f, c_f, h_b, c_b).  Gate order matches PyTorch:
# i, f, g, o.
# ----------------------------------------------------------------------------
def bilstm_layer_kernel(gf_ref, gb_ref, whhT_f_ref, whhT_b_ref,
                        out_f_ref, out_b_ref):
    T = gf_ref.shape[0]
    B = gf_ref.shape[1]
    H = whhT_f_ref.shape[0]

    def cell(g, h, c, whhT_ref):
        gates = g + jnp.dot(h, whhT_ref[...],
                            preferred_element_type=jnp.float32)   # (B, 4H)
        i = jax.nn.sigmoid(gates[:, 0 * H:1 * H])
        f = jax.nn.sigmoid(gates[:, 1 * H:2 * H])
        gg = jnp.tanh(gates[:, 2 * H:3 * H])
        o = jax.nn.sigmoid(gates[:, 3 * H:4 * H])
        c_new = f * c + i * gg
        h_new = o * jnp.tanh(c_new)
        return h_new, c_new

    def step(t, carry):
        h_f, c_f, h_b, c_b = carry
        tb = T - 1 - t
        h_f, c_f = cell(gf_ref[t], h_f, c_f, whhT_f_ref)
        h_b, c_b = cell(gb_ref[tb], h_b, c_b, whhT_b_ref)
        out_f_ref[t] = h_f
        out_b_ref[tb] = h_b
        return (h_f, c_f, h_b, c_b)

    z = jnp.zeros((B, H), jnp.float32)
    lax.fori_loop(0, T, step, (z, z, z, z))


def run_bilstm_layer(x, p):
    """x: (T, B, I) -> (T, B, 2H), matching one torch bidirectional LSTM layer."""
    T, B, _ = x.shape
    w_ihT_f, w_hhT_f, b_f = p["fwd"]      # (I, 4H), (H, 4H), (1, 4H)
    w_ihT_b, w_hhT_b, b_b = p["bwd"]
    H = w_hhT_f.shape[0]

    # Hoisted input projection for both directions as ONE large matmul.
    w_cat = jnp.concatenate([w_ihT_f, w_ihT_b], axis=1)           # (I, 8H)
    b_cat = jnp.concatenate([b_f, b_b], axis=1)                   # (1, 8H)
    g = jnp.einsum('tbi,ig->tbg', x, w_cat) + b_cat               # (T, B, 8H)
    g_f = g[..., :4 * H]
    g_b = g[..., 4 * H:]

    out_f, out_b = pl.pallas_call(
        bilstm_layer_kernel,
        out_shape=(jax.ShapeDtypeStruct((T, B, H), jnp.float32),
                   jax.ShapeDtypeStruct((T, B, H), jnp.float32)),
    )(g_f, g_b, w_hhT_f, w_hhT_b)
    return jnp.concatenate([out_f, out_b], axis=-1)               # (T, B, 2H)


def bidirectional_lstm(x, layer_params):
    """layer_params: list (per layer) of dicts with 'fwd'/'bwd' weight tuples."""
    out = x
    for p in layer_params:
        out = run_bilstm_layer(out, p)
    return out


# ----------------------------------------------------------------------------
# Kernel 2: the head (small, single VMEM-resident call, no grid).
#   seq_feat   = seq_flat   @ W_fc_seq^T   + b      (B, smile_o)
#   smile_feat = smile_flat @ W_fc_smile^T + b      (B, seq_o)
#   combined   = concat(smile_feat, seq_feat)       (B, smile_o + seq_o)
#   batch-norm (affine=False, training batch stats, eps=1e-5)
#   Linear->ReLU->Linear->ReLU->Linear -> log_softmax(dim=1)
# All weights arrive pre-transposed to (in, out): no in-kernel transpose.
# ----------------------------------------------------------------------------
def head_kernel(smile_flat_ref, seq_flat_ref,
                wT_fc_seq_ref, b_fc_seq_ref,
                wT_fc_smile_ref, b_fc_smile_ref,
                wT1_ref, b1_ref, wT2_ref, b2_ref, wT3_ref, b3_ref,
                out_ref):
    def lin(x, wT_ref, b_ref):
        return jnp.dot(x, wT_ref[...],
                       preferred_element_type=jnp.float32) + b_ref[...]

    seq_feat = lin(seq_flat_ref[...], wT_fc_seq_ref, b_fc_seq_ref)          # (B, smile_o)
    smile_feat = lin(smile_flat_ref[...], wT_fc_smile_ref, b_fc_smile_ref)  # (B, seq_o)

    comb = jnp.concatenate([smile_feat, seq_feat], axis=1)

    # BatchNorm1d(affine=False), training-mode batch statistics (biased var).
    mean = jnp.mean(comb, axis=0, keepdims=True)
    var = jnp.mean((comb - mean) ** 2, axis=0, keepdims=True)
    comb = (comb - mean) * lax.rsqrt(var + 1e-5)

    h1 = jnp.maximum(lin(comb, wT1_ref, b1_ref), 0.0)
    h2 = jnp.maximum(lin(h1, wT2_ref, b2_ref), 0.0)
    logits = lin(h2, wT3_ref, b3_ref)

    m = jnp.max(logits, axis=1, keepdims=True)
    z = logits - m
    lse = jnp.log(jnp.sum(jnp.exp(z), axis=1, keepdims=True))
    out_ref[...] = z - lse                                                   # LogSoftmax


def run_head(smile_flat, seq_flat, head_params, output_dim):
    B = smile_flat.shape[0]
    return pl.pallas_call(
        head_kernel,
        out_shape=jax.ShapeDtypeStruct((B, output_dim), jnp.float32),
    )(smile_flat, seq_flat, *head_params)


# ----------------------------------------------------------------------------
# Parameter construction (deterministic, PyTorch-style uniform init shapes).
# All weights are stored PRE-TRANSPOSED for the kernels.
# ----------------------------------------------------------------------------
def _uniform(key, shape, scale):
    return jax.random.uniform(key, shape, jnp.float32, -scale, scale)


def make_lstm_params(key, input_dim, hidden, num_layers):
    params = []
    scale = 1.0 / float(jnp.sqrt(hidden))
    for layer in range(num_layers):
        in_dim = input_dim if layer == 0 else 2 * hidden
        layer_p = {}
        for dirname in ("fwd", "bwd"):
            key, k1, k2, k3, k4 = jax.random.split(key, 5)
            w_ih = _uniform(k1, (4 * hidden, in_dim), scale)
            w_hh = _uniform(k2, (4 * hidden, hidden), scale)
            b_ih = _uniform(k3, (4 * hidden,), scale)
            b_hh = _uniform(k4, (4 * hidden,), scale)
            layer_p[dirname] = (
                jnp.transpose(w_ih),                       # (I, 4H)
                jnp.transpose(w_hh),                       # (H, 4H)
                (b_ih + b_hh).reshape(1, 4 * hidden),      # (1, 4H)
            )
        params.append(layer_p)
    return params, key


def make_linear_params(key, in_dim, out_dim):
    key, k1, k2 = jax.random.split(key, 3)
    scale = 1.0 / float(jnp.sqrt(in_dim))
    w = _uniform(k1, (out_dim, in_dim), scale)
    b = _uniform(k2, (1, out_dim), scale)
    return (jnp.transpose(w), b), key                       # (in, out), (1, out)


# ----------------------------------------------------------------------------
# Full forward pass (glue in plain JAX, hot paths in Pallas).
# ----------------------------------------------------------------------------
def blstm_forward(x1, x2, params, cfg):
    # Bidirectional LSTMs.
    out_smile = bidirectional_lstm(x1, params["lstm_smile"])  # (Ts, B, 2*Hs)
    out_seq = bidirectional_lstm(x2, params["lstm_seq"])      # (Tq, B, 2*Hq)

    # Dropout -> identity (see TODO at top).

    # Reproduce PyTorch .view(-1, T*H*2) on the contiguous time-major
    # (T, B, 2H) tensor: a plain row-major reshape (intentionally matches the
    # reference, which does NOT permute to batch-major before .view).
    B = x1.shape[1]
    smile_flat = out_smile.reshape(B, cfg["smile_len"] * cfg["hidden_smile"] * 2)
    seq_flat = out_seq.reshape(B, cfg["seq_len"] * cfg["hidden_seq"] * 2)

    head_params = (
        params["fc_seq"][0], params["fc_seq"][1],
        params["fc_smile"][0], params["fc_smile"][1],
        params["fc1"][0], params["fc1"][1],
        params["fc2"][0], params["fc2"][1],
        params["fc3"][0], params["fc3"][1],
    )
    return run_head(smile_flat, seq_flat, head_params, cfg["output_dim"])


if __name__ == "__main__":
    # Small, shape-consistent configuration.
    cfg = dict(
        smile_len=8, seq_len=8, batch=2,
        input_smile=4, input_seq=5,
        hidden_smile=8, hidden_seq=8,
        layers_smile=1, layers_seq=1,
        smile_o=16, seq_o=16,
        output_dim=3,
    )

    key = jax.random.PRNGKey(0)

    params = {}
    params["lstm_smile"], key = make_lstm_params(
        key, cfg["input_smile"], cfg["hidden_smile"], cfg["layers_smile"])
    params["lstm_seq"], key = make_lstm_params(
        key, cfg["input_seq"], cfg["hidden_seq"], cfg["layers_seq"])
    params["fc_seq"], key = make_linear_params(
        key, cfg["seq_len"] * cfg["hidden_seq"] * 2, cfg["smile_o"])
    params["fc_smile"], key = make_linear_params(
        key, cfg["smile_len"] * cfg["hidden_smile"] * 2, cfg["seq_o"])
    params["fc1"], key = make_linear_params(key, cfg["smile_o"] + cfg["seq_o"], 100)
    params["fc2"], key = make_linear_params(key, 100, 10)
    params["fc3"], key = make_linear_params(key, 10, cfg["output_dim"])

    key, kx1, kx2 = jax.random.split(key, 3)
    x1 = jax.random.normal(kx1, (cfg["smile_len"], cfg["batch"], cfg["input_smile"]),
                           jnp.float32)
    x2 = jax.random.normal(kx2, (cfg["seq_len"], cfg["batch"], cfg["input_seq"]),
                           jnp.float32)

    pred = blstm_forward(x1, x2, params, cfg)
    jax.block_until_ready(pred)
    assert pred.shape == (cfg["batch"], cfg["output_dim"])
    print("KERNEL_OK")
</pallas_src>

<mosaic_0001>
module attributes {stable_mosaic.version = 11 : i64} {
  func.func @bilstm_layer_kernel(%arg0: memref<8x2x32xf32, #tpu.memory_space<vmem>>, %arg1: memref<8x2x32xf32, #tpu.memory_space<vmem>>, %arg2: memref<8x32xf32, #tpu.memory_space<vmem>>, %arg3: memref<8x32xf32, #tpu.memory_space<vmem>>, %arg4: memref<8x2x8xf32, #tpu.memory_space<vmem>>, %arg5: memref<8x2x8xf32, #tpu.memory_space<vmem>>) attributes {dimension_semantics = [], scalar_prefetch = 0 : i64, scratch_operands = 0 : i64, tpu.core_type = #tpu.core_type<tc>} {
    %cst = arith.constant 0.000000e+00 : f32
    %0 = vector.broadcast %cst : f32 to vector<2x8xf32>
    %c0_i32 = arith.constant 0 : i32
    %c8_i32 = arith.constant 8 : i32
    %1 = arith.addi %c0_i32, %c8_i32 : i32
    %c1_i32 = arith.constant 1 : i32
    %2:4 = scf.for %arg6 = %c0_i32 to %1 step %c1_i32 iter_args(%arg7 = %0, %arg8 = %0, %arg9 = %0, %arg10 = %0) -> (vector<2x8xf32>, vector<2x8xf32>, vector<2x8xf32>, vector<2x8xf32>)  : i32 {
      %c7_i32 = arith.constant 7 : i32
      %3 = arith.subi %c7_i32, %arg6 : i32
      %4 = arith.index_cast %arg6 : i32 to index
      %c0 = arith.constant 0 : index
      %c0_1 = arith.constant 0 : index
      %5 = vector.load %arg0[%4, %c0, %c0_1] : memref<8x2x32xf32, #tpu.memory_space<vmem>>, vector<1x2x32xf32>
      %6 = vector.shape_cast %5 : vector<1x2x32xf32> to vector<2x32xf32>
      %c0_2 = arith.constant 0 : index
      %c0_3 = arith.constant 0 : index
      %7 = vector.load %arg2[%c0_2, %c0_3] : memref<8x32xf32, #tpu.memory_space<vmem>>, vector<8x32xf32>
      %cst_4 = arith.constant dense<0.000000e+00> : vector<2x32xf32>
      %8 = tpu.matmul %arg7, %7, %cst_4 {dimension_numbers = #tpu.dot_dimension_numbers<[1], [0], [0], [1], [0, 0, 1, 1], [], []>} : vector<2x8xf32>, vector<8x32xf32>, vector<2x32xf32> -> vector<2x32xf32>
      %9 = arith.addf %6, %8 : vector<2x32xf32>
      %10 = vector.extract_strided_slice %9 {offsets = [0, 0], sizes = [2, 8], strides = [1, 1]} : vector<2x32xf32> to vector<2x8xf32>
      %11 = arith.negf %10 : vector<2x8xf32>
      %12 = math.exp %11 : vector<2x8xf32>
      %cst_5 = arith.constant 1.000000e+00 : f32
      %13 = vector.broadcast %cst_5 : f32 to vector<2x8xf32>
      %14 = arith.addf %13, %12 : vector<2x8xf32>
      %15 = arith.divf %13, %14 : vector<2x8xf32>
      %16 = vector.extract_strided_slice %9 {offsets = [0, 8], sizes = [2, 8], strides = [1, 1]} : vector<2x32xf32> to vector<2x8xf32>
      %17 = arith.negf %16 : vector<2x8xf32>
      %18 = math.exp %17 : vector<2x8xf32>
      %cst_6 = arith.constant 1.000000e+00 : f32
      %19 = vector.broadcast %cst_6 : f32 to vector<2x8xf32>
      %20 = arith.addf %19, %18 : vector<2x8xf32>
      %21 = arith.divf %19, %20 : vector<2x8xf32>
      %22 = vector.extract_strided_slice %9 {offsets = [0, 16], sizes = [2, 8], strides = [1, 1]} : vector<2x32xf32> to vector<2x8xf32>
      %23 = math.tanh %22 : vector<2x8xf32>
      %24 = vector.extract_strided_slice %9 {offsets = [0, 24], sizes = [2, 8], strides = [1, 1]} : vector<2x32xf32> to vector<2x8xf32>
      %25 = arith.negf %24 : vector<2x8xf32>
      %26 = math.exp %25 : vector<2x8xf32>
      %cst_7 = arith.constant 1.000000e+00 : f32
      %27 = vector.broadcast %cst_7 : f32 to vector<2x8xf32>
      %28 = arith.addf %27, %26 : vector<2x8xf32>
      %29 = arith.divf %27, %28 : vector<2x8xf32>
      %30 = arith.mulf %21, %arg8 : vector<2x8xf32>
      %31 = arith.mulf %15, %23 : vector<2x8xf32>
      %32 = arith.addf %30, %31 : vector<2x8xf32>
      %33 = math.tanh %32 : vector<2x8xf32>
      %34 = arith.mulf %29, %33 : vector<2x8xf32>
      %35 = arith.index_cast %3 : i32 to index
      %c0_8 = arith.constant 0 : index
      %c0_9 = arith.constant 0 : index
      %36 = vector.load %arg1[%35, %c0_8, %c0_9] : memref<8x2x32xf32, #tpu.memory_space<vmem>>, vector<1x2x32xf32>
      %37 = vector.shape_cast %36 : vector<1x2x32xf32> to vector<2x32xf32>
      %c0_10 = arith.constant 0 : index
      %c0_11 = arith.constant 0 : index
      %38 = vector.load %arg3[%c0_10, %c0_11] : memref<8x32xf32, #tpu.memory_space<vmem>>, vector<8x32xf32>
      %cst_12 = arith.constant dense<0.000000e+00> : vector<2x32xf32>
      %39 = tpu.matmul %arg9, %38, %cst_12 {dimension_numbers = #tpu.dot_dimension_numbers<[1], [0], [0], [1], [0, 0, 1, 1], [], []>} : vector<2x8xf32>, vector<8x32xf32>, vector<2x32xf32> -> vector<2x32xf32>
      %40 = arith.addf %37, %39 : vector<2x32xf32>
      %41 = vector.extract_strided_slice %40 {offsets = [0, 0], sizes = [2, 8], strides = [1, 1]} : vector<2x32xf32> to vector<2x8xf32>
      %42 = arith.negf %41 : vector<2x8xf32>
      %43 = math.exp %42 : vector<2x8xf32>
      %cst_13 = arith.constant 1.000000e+00 : f32
      %44 = vector.broadcast %cst_13 : f32 to vector<2x8xf32>
      %45 = arith.addf %44, %43 : vector<2x8xf32>
      %46 = arith.divf %44, %45 : vector<2x8xf32>
      %47 = vector.extract_strided_slice %40 {offsets = [0, 8], sizes = [2, 8], strides = [1, 1]} : vector<2x32xf32> to vector<2x8xf32>
      %48 = arith.negf %47 : vector<2x8xf32>
      %49 = math.exp %48 : vector<2x8xf32>
      %cst_14 = arith.constant 1.000000e+00 : f32
      %50 = vector.broadcast %cst_14 : f32 to vector<2x8xf32>
      %51 = arith.addf %50, %49 : vector<2x8xf32>
      %52 = arith.divf %50, %51 : vector<2x8xf32>
      %53 = vector.extract_strided_slice %40 {offsets = [0, 16], sizes = [2, 8], strides = [1, 1]} : vector<2x32xf32> to vector<2x8xf32>
      %54 = math.tanh %53 : vector<2x8xf32>
      %55 = vector.extract_strided_slice %40 {offsets = [0, 24], sizes = [2, 8], strides = [1, 1]} : vector<2x32xf32> to vector<2x8xf32>
      %56 = arith.negf %55 : vector<2x8xf32>
      %57 = math.exp %56 : vector<2x8xf32>
      %cst_15 = arith.constant 1.000000e+00 : f32
      %58 = vector.broadcast %cst_15 : f32 to vector<2x8xf32>
      %59 = arith.addf %58, %57 : vector<2x8xf32>
      %60 = arith.divf %58, %59 : vector<2x8xf32>
      %61 = arith.mulf %52, %arg10 : vector<2x8xf32>
      %62 = arith.mulf %46, %54 : vector<2x8xf32>
      %63 = arith.addf %61, %62 : vector<2x8xf32>
      %64 = math.tanh %63 : vector<2x8xf32>
      %65 = arith.mulf %60, %64 : vector<2x8xf32>
      %66 = arith.index_cast %arg6 : i32 to index
      %c0_16 = arith.constant 0 : index
      %c0_17 = arith.constant 0 : index
      %67 = vector.load %arg4[%66, %c0_16, %c0_17] : memref<8x2x8xf32, #tpu.memory_space<vmem>>, vector<1x2x8xf32>
      %68 = vector.shape_cast %67 : vector<1x2x8xf32> to vector<2x8xf32>
      %69 = vector.shape_cast %34 : vector<2x8xf32> to vector<1x2x8xf32>
      tpu.vector_store %arg4[%66, %c0_16, %c0_17], %69 {strides = array<i32>} : memref<8x2x8xf32, #tpu.memory_space<vmem>>, vector<1x2x8xf32>,
      %70 = arith.index_cast %3 : i32 to index
      %c0_18 = arith.constant 0 : index
      %c0_19 = arith.constant 0 : index
      %71 = vector.load %arg5[%70, %c0_18, %c0_19] : memref<8x2x8xf32, #tpu.memory_space<vmem>>, vector<1x2x8xf32>
      %72 = vector.shape_cast %71 : vector<1x2x8xf32> to vector<2x8xf32>
      %73 = vector.shape_cast %65 : vector<2x8xf32> to vector<1x2x8xf32>
      tpu.vector_store %arg5[%70, %c0_18, %c0_19], %73 {strides = array<i32>} : memref<8x2x8xf32, #tpu.memory_space<vmem>>, vector<1x2x8xf32>,
      scf.yield %34, %32, %65, %63 : vector<2x8xf32>, vector<2x8xf32>, vector<2x8xf32>, vector<2x8xf32>
    }
    %c8_i32_0 = arith.constant 8 : i32
    return
  }
}

</mosaic_0001>

<bundles_post_ra>
// kernel: tpu_custom_call.1
= control target key start
LH: loop header
LB: loop body
LE: loop exit
PB: predicated region body
PF: predicated region fallthrough
CT: control target
= control target key end

     0   :  { %11 = vsyncpa [#allocation3], 0  ;;  %s776_s0 = inlined_call_operand.hbm [shape: f32[8,2,32], index: 0, kind: input, shape index: {}]   ;;  %s777_s1 = inlined_call_operand.hbm [shape: f32[8,2,32], index: 1, kind: input, shape index: {}]   ;;  %s778_s2 = inlined_call_operand.hbm [shape: f32[8,32], index: 2, kind: input, shape index: {}]   ;;  %s779_s3 = inlined_call_operand.vmem [shape: f32[8,32], index: 3, kind: input, shape index: {}]   ;;  %s780_s4 = inlined_call_operand.hbm [shape: f32[8,2,8], index: 4, kind: output, shape index: {0}]   ;;  %s781_s5 = inlined_call_operand.hbm [shape: f32[8,2,8], index: 5, kind: output, shape index: {1}]  }
   0x1   :  { %12 = vsyncpa [#allocation6], 0 }
   0x2   :  { %13 = vsyncpa [#allocation4], 0 }
   0x3   :  { %14 = vsyncpa [#allocation10], 0  ;;  %s599_s18 = smov [#allocation5]   ;;  %s600_s20 = smov [#allocation2]  }
   0x4   :  { %s32_s19 = sshll.u32 %s599_s18, 4  ;;  %s20_s21 = sshll.u32 %s600_s20, 4  ;;  %s33_s19 = int_to_ptr.vmem [resolvable:$true] %s32_s19  ;;  %s642_s21 = int_to_ptr.vmem [resolvable:$true] %s20_s21 }
   0x5   :  { %s441_s24 = scalar_lea.hbm %s777_s1, 256 }
   0x6   :  { %p442_p0 = scmp.ne.s32.totalorder %s777_s1, %s441_s24  ;;  %p445_p1 = scmp.lt.u32.totalorder %s441_s24, %s777_s1 }
   0x8   :  { %p447_p2 = pnand %p445_p1, %p442_p0 }
   0xa   :  { %450 = shalt.err (!%p447_p2)
}
   0xb   :  { %s451_s29 = scalar_lea.vmem %s33_s19, 256  ;;  %p456_p4 = scmp.lt.s32.totalorder %s33_s19, %s33_s19 }
   0xc   :  { %p452_p3 = scmp.ne.s32.totalorder %s33_s19, %s451_s29  ;;  %p457_p5 = scmp.lt.s32.totalorder %s451_s29, %s451_s29 }
   0xe   :  { %p458_p6 = por %p457_p5, %p456_p4 }
  0x10   :  { %p459_p7 = pnand %p458_p6, %p452_p3 }
  0x12   :  { %462 = shalt.err (!%p459_p7)
}
  0x13   :  { %s601_s30 = smov 32   ;;  %s602_s6 = smov 2  }
  0x14   :  { %38 = dma.hbm_to_vmem [thread:$0]  %s777_s1, 256, %s33_s19, [#allocation6], %s601_s30, %s601_s30, %s602_s6  }
  0x15   :  { %s463_s11 = scalar_lea.hbm %s776_s0, 256 }
  0x16   :  { %p464_p8 = scmp.ne.s32.totalorder %s776_s0, %s463_s11  ;;  %p467_p9 = scmp.lt.u32.totalorder %s463_s11, %s776_s0 }
  0x18   :  { %p469_p10 = pnand %p467_p9, %p464_p8 }
  0x1a   :  { %472 = shalt.err (!%p469_p10)
}
  0x1b   :  { %s473_s16 = scalar_lea.vmem %s642_s21, 256  ;;  %p478_p12 = scmp.lt.s32.totalorder %s642_s21, %s642_s21 }
  0x1c   :  { %p474_p11 = scmp.ne.s32.totalorder %s642_s21, %s473_s16  ;;  %p479_p13 = scmp.lt.s32.totalorder %s473_s16, %s473_s16 }
  0x1e   :  { %p480_p0 = por %p479_p13, %p478_p12 }
  0x20   :  { %p481_p1 = pnand %p480_p0, %p474_p11 }
  0x22   :  { %484 = shalt.err (!%p481_p1)
}
  0x23   :  { %26 = dma.hbm_to_vmem [thread:$0]  %s776_s0, 256, %s642_s21, [#allocation3], %s601_s30, %s601_s30, %s602_s6  }
  0x24   :  { %s603_s18 = smov [#allocation7]   ;;  %s485_s23 = scalar_lea.hbm %s778_s2, 128 }
  0x25   :  { %s45_s19 = sshll.u32 %s603_s18, 4  ;;  %p486_p2 = scmp.ne.s32.totalorder %s778_s2, %s485_s23  ;;  %s46_s19 = int_to_ptr.vmem [resolvable:$true] %s45_s19 }
  0x26   :  { %p489_p3 = scmp.lt.u32.totalorder %s485_s23, %s778_s2 }
  0x28   :  { %p491_p4 = pnand %p489_p3, %p486_p2 }
  0x2a   :  { %494 = shalt.err (!%p491_p4)
}
  0x2b   :  { %s495_s28 = scalar_lea.vmem %s46_s19, 128  ;;  %p500_p6 = scmp.lt.s32.totalorder %s46_s19, %s46_s19 }
  0x2c   :  { %p496_p5 = scmp.ne.s32.totalorder %s46_s19, %s495_s28  ;;  %p501_p7 = scmp.lt.s32.totalorder %s495_s28, %s495_s28 }
  0x2e   :  { %p502_p8 = por %p501_p7, %p500_p6 }
  0x30   :  { %p503_p9 = pnand %p502_p8, %p496_p5 }
  0x32   :  { %506 = shalt.err (!%p503_p9)
}
  0x33   :  { %48 = dma.hbm_to_vmem [thread:$0]  %s778_s2, 128, %s46_s19, [#allocation6]  }
  0x34   :  { %571 = dma.done.wait [#allocation3], 256  }
  0x35   :  { %572 = vsyncadd [#allocation3], 4294967040 }
  0x36   :  { %573 = dma.done.wait [#allocation6], 384  }
  0x37   :  { %574 = vsyncadd [#allocation6], 4294966912  ;;  %v691_v0 = vmov 0.0   ;;  %v693_v1 = vmov 0.0   ;;  %v695_v2 = vmov 0.0   ;;  %v697_v3 = vmov 0.0  }
  0x38   :  { %s699_s29 = smov 0  }
  0x39 LB: > { %v74_v4 = vld [vmem:[#allocation7] sm:$0xff]  ;;  %v604_v5 = vmov 0.0   ;;  %vm605_vm0 = vmmov 0   ;;  %s606_s8 = smov 104   ;;  %vm78_vm1 = vcmask 64512   ;;  %s352_s9 = sshll.u32 %s597_s29, 1  ;;  %s597_s29 = sphi %s699_s29, %s65_s29   ;;  %v593_v3 = vphi %v697_v3, %v175_v3   ;;  %v589_v2 = vphi %v695_v2, %v169_v2   ;;  %v585_v1 = vphi %v693_v1, %v279_v1   ;;  %v581_v0 = vphi %v691_v0, %v273_v0  }
  0x3a   : > { %362 = vmatprep.subr.mxu0 %v604_v5  ;;  %364 = vmatprep.mubr.msk.f32.mxu0 %vm605_vm0, %v604_v5  ;;  %v179_v6 = vld [vmem:[%s779_s3] sm:$0xff]  ;;  %s70_s10 = ssub.s32 7, %s597_s29  ;;  %s72_s12 = scalar_lea.vmem [#allocation2], %s352_s9  ;;  %vm285_vm2 = vcmask 58368  }
  0x3b   : > { %76 = vrot.lane.b32.xlu0 %v593_v3, %s606_s8  ;;  %363 = vmatpush3.msra.mxu0 %v74_v4  ;;  %s717_s11 = sshll.u32 %s70_s10, 1  ;;  %v73_v9 = vld [vmem:[%s72_s12] sm:$0x3]  ;;  %s607_s14 = smov 112  }
  0x3c   : > { %367 = vmatprep.subr.mxu1 %v604_v5  ;;  %369 = vmatprep.mubr.msk.f32.mxu1 %vm605_vm0, %v604_v5  ;;  %s177_s13 = scalar_lea.vmem [#allocation5], %s717_s11  ;;  %s608_s15 = smov 8  }
  0x3d   : > { %368 = vmatpush3.msra.mxu1 %v179_v6  ;;  %v178_v13 = vld [vmem:[%s177_s13] sm:$0x3]  ;;  %s609_s16 = smov 16   ;;  %s284_s1 = scalar_lea.vmem [#allocation8], %s352_s9 }
  0x3e   : > { %s291_s17 = scalar_lea.vmem [#allocation9], %s717_s11  ;;  %s65_s29 = sadd.s32 1, %s597_s29  }
  0x3f   : > { %181 = vrot.lane.b32.xlu0 %v585_v1, %s606_s8  ;;  %p62_p10 = scmp.ge.s32.totalorder %s65_s29, 8  }
  0x40   :  { %s610_s18 = smov (%p62_p10), [#allocation8]   ;;  %s611_s20 = smov (%p62_p10), [#allocation9]  }
  0x41   :  { %s298_s19 = sshll.u32 (%p62_p10), %s610_s18, 4  ;;  %s310_s22 = sshll.u32 (%p62_p10), %s611_s20, 4  ;;  %s299_s19 = int_to_ptr.vmem [resolvable:$true] %s298_s19  ;;  %s739_s22 = int_to_ptr.vmem [resolvable:$true] %s310_s22 }
  0x42   :  { %s507_s23 = scalar_lea.vmem (%p62_p10), %s299_s19, 256  ;;  %p512_p12 = scmp.lt.s32.totalorder (%p62_p10), %s299_s19, %s299_s19 }
  0x43   :  { %p508_p11 = scmp.ne.s32.totalorder (%p62_p10), %s299_s19, %s507_s23  ;;  %p513_p13 = scmp.lt.s32.totalorder (%p62_p10), %s507_s23, %s507_s23 }
  0x45   :  { %p514_p0 = por (%p62_p10), %p513_p13, %p512_p12 }
  0x47   :  { %p515_p1 = pnand (%p62_p10), %p514_p0, %p508_p11 }
  0xad   : > { %v77_v7 = vpop.permute.xlu0 %76 }
  0xae   : > { %365 = vmatmul.mubr.msk.f32.vlgmr.msra.gmra.mrb[0].mxu0 %vm78_vm1, %v77_v7 }
  0xb1   : > { %v182_v8 = vpop.permute.xlu0 %181 }
  0xb2   : > { %370 = vmatmul.mubr.msk.f32.vlgmr.msra.gmra.mrb[0].mxu1 %vm78_vm1, %v182_v8 }
 0x181   : > { %v147_v10 = vpop.f32.mrb[0].mxu0 }
 0x182   : > { %v151_v11 = vadd.f32 %v147_v10, %v73_v9  ;;  %v366_v12 = vpop.f32.mrb[1].mxu0 }
 0x184   : > { %425 = vtanh.f32 %v151_v11  ;;  %v354_v19 = vmul.f32 -1.442695, %v151_v11 }
 0x185   : > { %v251_v14 = vpop.f32.mrb[0].mxu1 }
 0x186   : > { %v255_v15 = vadd.f32 %v251_v14, %v178_v13  ;;  %v371_v16 = vpop.f32.mrb[1].mxu1 }
 0x188   : > { %427 = vtanh.f32 %v255_v15  ;;  %v357_v20 = vmul.f32 -1.442695, %v255_v15 }
 0x189   : > { %429 = vpow2.f32 %v354_v19 }
 0x18a   : > { %431 = vpow2.f32 %v357_v20 }
 0x18e   : > { %v426_v17 = vpop.eup %425 }
 0x18f   : > { %161 = vrot.lane.b32.xlu1 %v426_v17, %s607_s14 }
 0x192   : > { %v428_v18 = vpop.eup %427 }
 0x193   : > { %265 = vrot.lane.b32.xlu1 %v428_v18, %s607_s14  ;;  %v430_v21 = vpop.eup %429 }
 0x194   : > { %v155_v22 = vadd.f32 1.0, %v430_v21  ;;  %v432_v23 = vpop.eup %431 }
 0x195   : > { %v259_v24 = vadd.f32 1.0, %v432_v23 }
 0x196   : > { %433 = vrcp.f32 %v155_v22 }
 0x197   : > { %435 = vrcp.f32 %v259_v24 }
 0x1a0   : > { %v434_v25 = vpop.eup %433 }
 0x1a1   : > { %v436_v28 = vpop.eup %435  ;;  %v159_v31 = vmul.f32 %v589_v2, %v434_v25 }
 0x1a2   : > { %v263_v33 = vmul.f32 %v581_v0, %v436_v28 }
 0x201   : > { %v162_v26 = vpop.permute.xlu1 %161 }
 0x202   : > { %v164_v27 = vmul.f32 %v434_v25, %v162_v26 }
 0x204   : > { %166 = vrot.lane.b32.xlu0 %v164_v27, %s608_s15 }
 0x205   : > { %v266_v29 = vpop.permute.xlu1 %265 }
 0x206   : > { %v268_v30 = vmul.f32 %v436_v28, %v266_v29 }
 0x208   : > { %270 = vrot.lane.b32.xlu1 %v268_v30, %s608_s15 }
 0x276   : > { %v167_v32 = vpop.permute.xlu0 %166 }
 0x277   : > { %v169_v2 = vadd.f32 %v167_v32, %v159_v31  }
 0x279   : > { %437 = vtanh.f32 %v169_v2 }
 0x27a   : > { %v271_v34 = vpop.permute.xlu1 %270 }
 0x27b   : > { %v273_v0 = vadd.f32 %v271_v34, %v263_v33  }
 0x27d   : > { %439 = vtanh.f32 %v273_v0 }
 0x283   : > { %v438_v35 = vpop.eup %437 }
 0x284   : > { %172 = vrot.lane.b32.xlu0 %v438_v35, %s609_s16 }
 0x287   : > { %v440_v36 = vpop.eup %439 }
 0x288   : > { %276 = vrot.lane.b32.xlu1 %v440_v36, %s609_s16 }
 0x2f6   : > { %v173_v37 = vpop.permute.xlu0 %172 }
 0x2f7   : > { %v175_v3 = vmul.f32 %v434_v25, %v173_v37  }
 0x2f9   : > { %281 = vrot.lane.b32.xlu0 %v175_v3, %s606_s8 }
 0x2fa   : > { %v277_v38 = vpop.permute.xlu1 %276 }
 0x2fb   : > { %v279_v1 = vmul.f32 %v436_v28, %v277_v38  }
 0x2fd   : > { %288 = vrot.lane.b32.xlu1 %v279_v1, %s606_s8 }
 0x36a   :  { %64 = sbr.rel (!%p62_p10) target bundleno = 57 (0x39), region = 67 }
 0x36b   : > { %v282_v39 = vpop.permute.xlu0 %281 }
 0x36c   : > { %286 = vst.msk [vmem:[%s284_s1] sm:$0x3] %vm285_vm2, %v282_v39 }
 0x36f   : > { %v289_v40 = vpop.permute.xlu1 %288 }
 0x370   : > { %292 = vst.msk [vmem:[%s291_s17] sm:$0x3] %vm285_vm2, %v289_v40 }
 0x371   :  { %518 = shalt.err (!%p515_p1)
}
 0x372   :  { %s519_s26 = scalar_lea.hbm %s780_s4, 256 }
 0x373   :  { %p520_p2 = scmp.ne.s32.totalorder %s780_s4, %s519_s26  ;;  %p523_p3 = scmp.lt.u32.totalorder %s519_s26, %s780_s4 }
 0x375   :  { %p525_p4 = pnand %p523_p3, %p520_p2 }
 0x377   :  { %528 = shalt.err (!%p525_p4)
}
 0x378   :  { %304 = dma.vmem_to_hbm [thread:$0]  %s299_s19, 256, %s780_s4, [#allocation4], %s601_s30, %s601_s30, %s602_s6  }
 0x379   :  { %s529_s2 = scalar_lea.vmem %s739_s22, 256  ;;  %p534_p6 = scmp.lt.s32.totalorder %s739_s22, %s739_s22 }
 0x37a   :  { %p530_p5 = scmp.ne.s32.totalorder %s739_s22, %s529_s2  ;;  %p535_p7 = scmp.lt.s32.totalorder %s529_s2, %s529_s2 }
 0x37c   :  { %p536_p8 = por %p535_p7, %p534_p6 }
 0x37e   :  { %p537_p9 = pnand %p536_p8, %p530_p5 }
 0x380   :  { %540 = shalt.err (!%p537_p9)
}
 0x381   :  { %s541_s9 = scalar_lea.hbm %s781_s5, 256 }
 0x382   :  { %p542_p10 = scmp.ne.s32.totalorder %s781_s5, %s541_s9  ;;  %p545_p11 = scmp.lt.u32.totalorder %s541_s9, %s781_s5 }
 0x384   :  { %p547_p12 = pnand %p545_p11, %p542_p10 }
 0x386   :  { %550 = shalt.err (!%p547_p12)
}
 0x387   :  { %316 = dma.vmem_to_hbm [thread:$0]  %s739_s22, 256, %s781_s5, [#allocation10], %s601_s30, %s601_s30, %s602_s6  }
 0x388   :  { %575 = dma.done.wait [#allocation4], 256  }
 0x389   :  { %576 = vsyncadd [#allocation4], 4294967040 }
 0x38a   :  { %577 = dma.done.wait [#allocation10], 256  }
 0x38b   :  { %578 = vsyncadd [#allocation10], 4294967040 }
 0x38c   :  { %323 = vsyncpa [#allocation3], 1 }
 0x38d   :  { %324 = vsyncpa [#allocation6], 1 }
 0x38e   :  { %325 = vsyncpa [#allocation4], 1 }
 0x38f   :  { %326 = vsyncpa [#allocation10], 1 }

</bundles_post_ra>
